<compile_context>
chip_gen: v5e
topology: v5e:2x2
jax: 0.10.0
libtpu: 0.0.40
codegen_flags: <defaults>
</compile_context>

<pallas_src>
import numpy as np
import jax
import jax.numpy as jnp
from jax.experimental import pallas as pl
from jax.experimental.pallas import tpu as pltpu

HIDDEN = 256


def _cdiv(a, b):
    return (a + b - 1) // b


def _round_up(x, m):
    return ((x + m - 1) // m) * m


def qnet_multiact_kernel(x_ref, w1_ref, b1_ref, w2_ref, b2_ref,
                         w3_ref, b3_ref, w4_ref, b4_ref, out_ref):
    bf16 = jnp.bfloat16
    x = x_ref[...].astype(bf16)
    # DQNBase: Linear -> ReLU -> Linear -> ReLU   (bias add + ReLU kept in f32)
    h = jnp.dot(x, w1_ref[...], preferred_element_type=jnp.float32) + b1_ref[...]
    h = jnp.maximum(h, 0.0)
    h = jnp.dot(h.astype(bf16), w2_ref[...],
                preferred_element_type=jnp.float32) + b2_ref[...]
    h = jnp.maximum(h, 0.0)
    # head: Linear -> ReLU -> Linear
    h = jnp.dot(h.astype(bf16), w3_ref[...],
                preferred_element_type=jnp.float32) + b3_ref[...]
    h = jnp.maximum(h, 0.0)
    q = jnp.dot(h.astype(bf16), w4_ref[...],
                preferred_element_type=jnp.float32) + b4_ref[...]
    out_ref[...] = q.astype(out_ref.dtype)


def qnetwork_multiact_forward(states, params, *, tile_batch=2048,
                              core_parallel=False):
    """states: [B, num_channels] f32 -> q: [B, num_actions] f32.

    params: weights transposed to (in, out) and stored as bf16; biases f32.
    """
    (w1, b1, w2, b2, w3, b3, w4, b4) = params
    B, C = states.shape
    assert w1.shape[0] == C
    N = w4.shape[1]

    # Balanced batch tile: multiple of 8 sublanes, minimal tail padding.
    TB = _round_up(_cdiv(B, _cdiv(B, tile_batch)), 8)
    B_pad = _round_up(B, TB)

    x = states
    if B_pad != B:
        # Keep padded rows zero-filled so they can never poison anything.
        x = jnp.pad(x, ((0, B_pad - B), (0, 0)))

    grid = (B_pad // TB,)
    const = lambda i: (0, 0)  # weights/biases: same block every step -> resident

    in_specs = [
        pl.BlockSpec((TB, C), lambda i: (i, 0)),
        pl.BlockSpec((C, HIDDEN), const),
        pl.BlockSpec((1, HIDDEN), const),
        pl.BlockSpec((HIDDEN, HIDDEN), const),
        pl.BlockSpec((1, HIDDEN), const),
        pl.BlockSpec((HIDDEN, HIDDEN), const),
        pl.BlockSpec((1, HIDDEN), const),
        pl.BlockSpec((HIDDEN, N), const),
        pl.BlockSpec((1, N), const),
    ]
    out_spec = pl.BlockSpec((TB, N), lambda i: (i, 0))

    flops = 2 * B_pad * (C * HIDDEN + 2 * HIDDEN * HIDDEN + HIDDEN * N)
    bytes_accessed = (
        4 * (B_pad * C + B_pad * N)                              # states in, q out (f32)
        + 2 * (C * HIDDEN + 2 * HIDDEN * HIDDEN + HIDDEN * N)    # bf16 weights
        + 4 * (3 * HIDDEN + N))                                  # f32 biases

    batch_sem = pltpu.CORE_PARALLEL if core_parallel else "parallel"

    q_full = pl.pallas_call(
        qnet_multiact_kernel,
        out_shape=jax.ShapeDtypeStruct((B_pad, N), jnp.float32),
        grid=grid,
        in_specs=in_specs,
        out_specs=out_spec,
        compiler_params=pltpu.CompilerParams(
            dimension_semantics=(batch_sem,)),
        cost_estimate=pl.CostEstimate(
            flops=flops, transcendentals=0, bytes_accessed=bytes_accessed),
    )(x, w1, b1, w2, b2, w3, b3, w4, b4)

    if B_pad != B:
        q_full = q_full[:B]
    return q_full


def _kaiming_he_uniform(key, fan_in, fan_out):
    # torch.nn.init.kaiming_uniform_ defaults (a=0): bound = sqrt(6 / fan_in).
    bound = np.sqrt(6.0 / fan_in)
    return jax.random.uniform(key, (fan_in, fan_out), jnp.float32, -bound, bound)


def _torch_linear_default(key, fan_in, fan_out):
    # nn.Linear default: kaiming_uniform_(a=sqrt(5)) -> bound = 1/sqrt(fan_in);
    # bias ~ U(-1/sqrt(fan_in), 1/sqrt(fan_in)).
    kw, kb = jax.random.split(key)
    bound = 1.0 / np.sqrt(fan_in)
    w = jax.random.uniform(kw, (fan_in, fan_out), jnp.float32, -bound, bound)
    b = jax.random.uniform(kb, (1, fan_out), jnp.float32, -bound, bound)
    return w, b


def init_params(key, num_channels, num_actions):
    """Weights transposed to (in, out), stored bf16; biases f32.

    DQNBase layers use initialize_weights_he (kaiming a=0, bias 0); the head
    layers use torch's nn.Linear defaults, matching the PyTorch module.
    """
    k1, k2, k3, k4 = jax.random.split(key, 4)
    bf16 = jnp.bfloat16

    w1 = _kaiming_he_uniform(k1, num_channels, HIDDEN).astype(bf16)
    b1 = jnp.zeros((1, HIDDEN), jnp.float32)
    w2 = _kaiming_he_uniform(k2, HIDDEN, HIDDEN).astype(bf16)
    b2 = jnp.zeros((1, HIDDEN), jnp.float32)
    w3, b3 = _torch_linear_default(k3, HIDDEN, HIDDEN)
    w4, b4 = _torch_linear_default(k4, HIDDEN, num_actions)
    return (w1, b1, w2.astype(bf16), b2, w3.astype(bf16), b3,
            w4.astype(bf16), b4)


def reference_forward(states, params):
    """Pure-JAX reference using the identical mixed-precision math."""
    (w1, b1, w2, b2, w3, b3, w4, b4) = params
    bf16 = jnp.bfloat16
    f32 = jnp.float32
    h = jnp.maximum(
        jnp.dot(states.astype(bf16), w1, preferred_element_type=f32) + b1, 0.0)
    h = jnp.maximum(
        jnp.dot(h.astype(bf16), w2, preferred_element_type=f32) + b2, 0.0)
    h = jnp.maximum(
        jnp.dot(h.astype(bf16), w3, preferred_element_type=f32) + b3, 0.0)
    return jnp.dot(h.astype(bf16), w4, preferred_element_type=f32) + b4


if __name__ == "__main__":
    key = jax.random.PRNGKey(0)
    num_channels = 32
    actions = [4, 3]                       # multi-action spec
    num_actions = int(np.sum(actions))     # = 7
    batch = 8

    kx, kp = jax.random.split(key)
    states = jax.random.normal(kx, (batch, num_channels), jnp.float32)
    params = init_params(kp, num_channels, num_actions)

    q = qnetwork_multiact_forward(states, params)
    q = jax.block_until_ready(q)

    q_ref = reference_forward(states, params)
    assert q.shape == (batch, num_actions)
    np.testing.assert_allclose(np.asarray(q), np.asarray(q_ref),
                               rtol=1e-3, atol=1e-3)

    print("KERNEL_OK")
</pallas_src>

<mosaic_0001>
module attributes {stable_mosaic.version = 11 : i64} {
  func.func @qnet_multiact_kernel(%arg0: i32, %arg1: memref<8x32xf32, #tpu.memory_space<vmem>>, %arg2: memref<32x256xbf16, #tpu.memory_space<vmem>>, %arg3: memref<1x256xf32, #tpu.memory_space<vmem>>, %arg4: memref<256x256xbf16, #tpu.memory_space<vmem>>, %arg5: memref<1x256xf32, #tpu.memory_space<vmem>>, %arg6: memref<256x256xbf16, #tpu.memory_space<vmem>>, %arg7: memref<1x256xf32, #tpu.memory_space<vmem>>, %arg8: memref<256x7xbf16, #tpu.memory_space<vmem>>, %arg9: memref<1x7xf32, #tpu.memory_space<vmem>>, %arg10: memref<8x7xf32, #tpu.memory_space<vmem>>) attributes {dimension_semantics = [#tpu.dimension_semantics<parallel>], iteration_bounds = array<i64: 1>, scalar_prefetch = 0 : i64, scratch_operands = 0 : i64, tpu.core_type = #tpu.core_type<tc>, window_params = [{transform_indices = @transform_0, window_bounds = array<i64: 8, 32>}, {pipeline_mode = #tpu.pipeline_mode<synchronous>, transform_indices = @transform_1, window_bounds = array<i64: 32, 256>}, {pipeline_mode = #tpu.pipeline_mode<synchronous>, transform_indices = @transform_2, window_bounds = array<i64: 1, 256>}, {pipeline_mode = #tpu.pipeline_mode<synchronous>, transform_indices = @transform_3, window_bounds = array<i64: 256, 256>}, {pipeline_mode = #tpu.pipeline_mode<synchronous>, transform_indices = @transform_4, window_bounds = array<i64: 1, 256>}, {pipeline_mode = #tpu.pipeline_mode<synchronous>, transform_indices = @transform_5, window_bounds = array<i64: 256, 256>}, {pipeline_mode = #tpu.pipeline_mode<synchronous>, transform_indices = @transform_6, window_bounds = array<i64: 1, 256>}, {pipeline_mode = #tpu.pipeline_mode<synchronous>, transform_indices = @transform_7, window_bounds = array<i64: 256, 7>}, {pipeline_mode = #tpu.pipeline_mode<synchronous>, transform_indices = @transform_8, window_bounds = array<i64: 1, 7>}, {transform_indices = @transform_9, window_bounds = array<i64: 8, 7>}]} {
    %c0 = arith.constant 0 : index
    %c0_0 = arith.constant 0 : index
    %0 = vector.load %arg1[%c0, %c0_0] : memref<8x32xf32, #tpu.memory_space<vmem>>, vector<8x32xf32>
    %1 = arith.truncf %0 : vector<8x32xf32> to vector<8x32xbf16>
    %c0_1 = arith.constant 0 : index
    %c0_2 = arith.constant 0 : index
    %2 = vector.load %arg2[%c0_1, %c0_2] : memref<32x256xbf16, #tpu.memory_space<vmem>>, vector<32x256xbf16>
    %cst = arith.constant dense<0.000000e+00> : vector<8x256xf32>
    %3 = tpu.matmul %1, %2, %cst {dimension_numbers = #tpu.dot_dimension_numbers<[1], [0], [0], [1], [0, 0, 1, 1], [], []>} : vector<8x32xbf16>, vector<32x256xbf16>, vector<8x256xf32> -> vector<8x256xf32>
    %c0_3 = arith.constant 0 : index
    %c0_4 = arith.constant 0 : index
    %4 = vector.load %arg3[%c0_3, %c0_4] : memref<1x256xf32, #tpu.memory_space<vmem>>, vector<1x256xf32>
    %5 = vector.broadcast %4 : vector<1x256xf32> to vector<8x256xf32>
    %6 = arith.addf %3, %5 : vector<8x256xf32>
    %cst_5 = arith.constant 0.000000e+00 : f32
    %7 = vector.broadcast %cst_5 : f32 to vector<8x256xf32>
    %8 = arith.maximumf %6, %7 : vector<8x256xf32>
    %9 = arith.truncf %8 : vector<8x256xf32> to vector<8x256xbf16>
    %c0_6 = arith.constant 0 : index
    %c0_7 = arith.constant 0 : index
    %10 = vector.load %arg4[%c0_6, %c0_7] : memref<256x256xbf16, #tpu.memory_space<vmem>>, vector<256x256xbf16>
    %cst_8 = arith.constant dense<0.000000e+00> : vector<8x256xf32>
    %11 = tpu.matmul %9, %10, %cst_8 {dimension_numbers = #tpu.dot_dimension_numbers<[1], [0], [0], [1], [0, 0, 1, 1], [], []>} : vector<8x256xbf16>, vector<256x256xbf16>, vector<8x256xf32> -> vector<8x256xf32>
    %c0_9 = arith.constant 0 : index
    %c0_10 = arith.constant 0 : index
    %12 = vector.load %arg5[%c0_9, %c0_10] : memref<1x256xf32, #tpu.memory_space<vmem>>, vector<1x256xf32>
    %13 = vector.broadcast %12 : vector<1x256xf32> to vector<8x256xf32>
    %14 = arith.addf %11, %13 : vector<8x256xf32>
    %cst_11 = arith.constant 0.000000e+00 : f32
    %15 = vector.broadcast %cst_11 : f32 to vector<8x256xf32>
    %16 = arith.maximumf %14, %15 : vector<8x256xf32>
    %17 = arith.truncf %16 : vector<8x256xf32> to vector<8x256xbf16>
    %c0_12 = arith.constant 0 : index
    %c0_13 = arith.constant 0 : index
    %18 = vector.load %arg6[%c0_12, %c0_13] : memref<256x256xbf16, #tpu.memory_space<vmem>>, vector<256x256xbf16>
    %cst_14 = arith.constant dense<0.000000e+00> : vector<8x256xf32>
    %19 = tpu.matmul %17, %18, %cst_14 {dimension_numbers = #tpu.dot_dimension_numbers<[1], [0], [0], [1], [0, 0, 1, 1], [], []>} : vector<8x256xbf16>, vector<256x256xbf16>, vector<8x256xf32> -> vector<8x256xf32>
    %c0_15 = arith.constant 0 : index
    %c0_16 = arith.constant 0 : index
    %20 = vector.load %arg7[%c0_15, %c0_16] : memref<1x256xf32, #tpu.memory_space<vmem>>, vector<1x256xf32>
    %21 = vector.broadcast %20 : vector<1x256xf32> to vector<8x256xf32>
    %22 = arith.addf %19, %21 : vector<8x256xf32>
    %cst_17 = arith.constant 0.000000e+00 : f32
    %23 = vector.broadcast %cst_17 : f32 to vector<8x256xf32>
    %24 = arith.maximumf %22, %23 : vector<8x256xf32>
    %25 = arith.truncf %24 : vector<8x256xf32> to vector<8x256xbf16>
    %c0_18 = arith.constant 0 : index
    %c0_19 = arith.constant 0 : index
    %26 = vector.load %arg8[%c0_18, %c0_19] : memref<256x7xbf16, #tpu.memory_space<vmem>>, vector<256x7xbf16>
    %cst_20 = arith.constant dense<0.000000e+00> : vector<8x7xf32>
    %27 = tpu.matmul %25, %26, %cst_20 {dimension_numbers = #tpu.dot_dimension_numbers<[1], [0], [0], [1], [0, 0, 1, 1], [], []>} : vector<8x256xbf16>, vector<256x7xbf16>, vector<8x7xf32> -> vector<8x7xf32>
    %c0_21 = arith.constant 0 : index
    %c0_22 = arith.constant 0 : index
    %28 = vector.load %arg9[%c0_21, %c0_22] : memref<1x7xf32, #tpu.memory_space<vmem>>, vector<1x7xf32>
    %29 = vector.broadcast %28 : vector<1x7xf32> to vector<8x7xf32>
    %30 = arith.addf %27, %29 : vector<8x7xf32>
    %c0_23 = arith.constant 0 : index
    %c0_24 = arith.constant 0 : index
    %31 = vector.load %arg10[%c0_23, %c0_24] : memref<8x7xf32, #tpu.memory_space<vmem>>, vector<8x7xf32>
    tpu.vector_store %arg10[%c0_23, %c0_24], %30 {strides = array<i32>} : memref<8x7xf32, #tpu.memory_space<vmem>>, vector<8x7xf32>,
    return
  }
  func.func @transform_0(%arg0: i32) -> (i32, i32) {
    %c0_i32 = arith.constant 0 : i32
    %c0_i32_0 = arith.constant 0 : i32
    return %arg0, %c0_i32 : i32, i32
  }
  func.func @transform_1(%arg0: i32) -> (i32, i32) {
    %c0_i32 = arith.constant 0 : i32
    %c0_i32_0 = arith.constant 0 : i32
    %c0_i32_1 = arith.constant 0 : i32
    return %c0_i32, %c0_i32_0 : i32, i32
  }
  func.func @transform_2(%arg0: i32) -> (i32, i32) {
    %c0_i32 = arith.constant 0 : i32
    %c0_i32_0 = arith.constant 0 : i32
    %c0_i32_1 = arith.constant 0 : i32
    return %c0_i32, %c0_i32_0 : i32, i32
  }
  func.func @transform_3(%arg0: i32) -> (i32, i32) {
    %c0_i32 = arith.constant 0 : i32
    %c0_i32_0 = arith.constant 0 : i32
    %c0_i32_1 = arith.constant 0 : i32
    return %c0_i32, %c0_i32_0 : i32, i32
  }
  func.func @transform_4(%arg0: i32) -> (i32, i32) {
    %c0_i32 = arith.constant 0 : i32
    %c0_i32_0 = arith.constant 0 : i32
    %c0_i32_1 = arith.constant 0 : i32
    return %c0_i32, %c0_i32_0 : i32, i32
  }
  func.func @transform_5(%arg0: i32) -> (i32, i32) {
    %c0_i32 = arith.constant 0 : i32
    %c0_i32_0 = arith.constant 0 : i32
    %c0_i32_1 = arith.constant 0 : i32
    return %c0_i32, %c0_i32_0 : i32, i32
  }
  func.func @transform_6(%arg0: i32) -> (i32, i32) {
    %c0_i32 = arith.constant 0 : i32
    %c0_i32_0 = arith.constant 0 : i32
    %c0_i32_1 = arith.constant 0 : i32
    return %c0_i32, %c0_i32_0 : i32, i32
  }
  func.func @transform_7(%arg0: i32) -> (i32, i32) {
    %c0_i32 = arith.constant 0 : i32
    %c0_i32_0 = arith.constant 0 : i32
    %c0_i32_1 = arith.constant 0 : i32
    return %c0_i32, %c0_i32_0 : i32, i32
  }
  func.func @transform_8(%arg0: i32) -> (i32, i32) {
    %c0_i32 = arith.constant 0 : i32
    %c0_i32_0 = arith.constant 0 : i32
    %c0_i32_1 = arith.constant 0 : i32
    return %c0_i32, %c0_i32_0 : i32, i32
  }
  func.func @transform_9(%arg0: i32) -> (i32, i32) {
    %c0_i32 = arith.constant 0 : i32
    %c0_i32_0 = arith.constant 0 : i32
    return %arg0, %c0_i32 : i32, i32
  }
}

</mosaic_0001>

<bundles_post_ra>
// kernel: tpu_custom_call.1
= control target key start
LH: loop header
LB: loop body
LE: loop exit
PB: predicated region body
PF: predicated region fallthrough
CT: control target
= control target key end

     0   :  { %14 = vsyncpa [#allocation3], 0  ;;  %s1477_s0 = inlined_call_operand.vmem [shape: f32[8,32], index: 0, kind: input, shape index: {}]   ;;  %s1478_s1 = inlined_call_operand.vmem [shape: bf16[32,256], index: 1, kind: input, shape index: {}]   ;;  %s1479_s2 = inlined_call_operand.vmem [shape: f32[1,256], index: 2, kind: input, shape index: {}]   ;;  %s1480_s3 = inlined_call_operand.hbm [shape: bf16[256,256], index: 3, kind: input, shape index: {}]   ;;  %s1481_s4 = inlined_call_operand.vmem [shape: f32[1,256], index: 4, kind: input, shape index: {}]   ;;  %s1482_s5 = inlined_call_operand.hbm [shape: bf16[256,256], index: 5, kind: input, shape index: {}]   ;;  %s1483_s6 = inlined_call_operand.vmem [shape: f32[1,256], index: 6, kind: input, shape index: {}]   ;;  %s1484_s7 = inlined_call_operand.vmem [shape: bf16[256,7], index: 7, kind: input, shape index: {}]   ;;  %s1485_s8 = inlined_call_operand.vmem [shape: f32[1,7], index: 8, kind: input, shape index: {}]   ;;  %s1486_s9 = inlined_call_operand.hbm [shape: f32[8,7], index: 9, kind: output, shape index: {}]  }
   0x1   :  { %15 = vsyncpa [#allocation6], 0 }
   0x2   :  { %16 = vsyncpa [#allocation4], 0  ;;  %s27_s11 = sshll.u32 %s1480_s3, 4  ;;  %s1324_s12 = smov [#allocation2]   ;;  %s28_s11 = int_to_ptr.hbm [resolvable:$true] %s27_s11 }
   0x3   :  { %s29_s13 = sshll.u32 %s1324_s12, 4  ;;  %s42_s16 = sshll.u32 %s1482_s5, 4  ;;  %s30_s13 = int_to_ptr.vmem [resolvable:$true] %s29_s13  ;;  %s43_s16 = int_to_ptr.hbm [resolvable:$true] %s42_s16 }
   0x4   :  { %s1325_s17 = smov 128   ;;  %s1326_s18 = smov 8  }
   0x5   :  { %35 = dma.hbm_to_vmem [thread:$0]  %s28_s11, 4096, %s30_s13, [#allocation3], %s1325_s17, %s1325_s17, %s1326_s18  }
   0x6   :  { %s1327_s19 = smov [#allocation5]  }
   0x7   :  { %s44_s20 = sshll.u32 %s1327_s19, 4  ;;  %s45_s20 = int_to_ptr.vmem [resolvable:$true] %s44_s20 }
   0x8   :  { %50 = dma.hbm_to_vmem [thread:$0]  %s43_s16, 4096, %s45_s20, [#allocation6], %s1325_s17, %s1325_s17, %s1326_s18  }
   0x9   :  { %1318 = dma.done.wait [#allocation3], 4096  }
   0xa   :  { %1319 = vsyncadd [#allocation3], 4294963200 }
   0xb   :  { %1320 = dma.done.wait [#allocation6], 4096  }
   0xc   :  { %1321 = vsyncadd [#allocation6], 4294963200  ;;  %v828_v0 = vld [vmem:[%s1478_s1 + $0x10] sm:$0xf]  ;;  %v1159_v1 = vld [vmem:[%s1478_s1 + $0x14] sm:$0xf0] }
   0xd   :  { %v1158_v2 = vld [vmem:[%s1478_s1 + $0x14] sm:$0xf]  ;;  %v829_v3 = vor.u32 %v1159_v1, %v828_v0  ;;  %v830_v4 = vld [vmem:[%s1478_s1 + $0x18] sm:$0xf0]  ;;  %v820_v5 = vld [vmem:[%s1478_s1] sm:$0xf] }
   0xe   :  { %v1157_v6 = vld [vmem:[%s1478_s1 + $0x4] sm:$0xf0]  ;;  %v833_v7 = vor.u32 %v1158_v2, %v830_v4  ;;  %v1156_v8 = vld [vmem:[%s1478_s1 + $0x4] sm:$0xf]  ;;  %v822_v9 = vld [vmem:[%s1478_s1 + $0x8] sm:$0xf0] }
   0xf   :  { %v66_v10 = vld [vmem:[%s1477_s0] sm:$0xff]  ;;  %vm98_vm0 = vcmask 261120   ;;  %108 = vmatpush.bf16.msra.mxu0 %v829_v3  ;;  %v821_v11 = vor.u32 %v1157_v6, %v820_v5  ;;  %v894_v12 = vld [vmem:[#allocation2 + $0x70] sm:$0xf]  ;;  %v1175_v13 = vld [vmem:[#allocation2 + $0x74] sm:$0xf0]  ;;  %v825_v15 = vor.u32 %v1156_v8, %v822_v9 }
  0x10   :  { %v958_v14 = vld [vmem:[#allocation2 + $0xf0] sm:$0xf]  ;;  %121 = vmatpush.bf16.msra.mxu1 %v833_v7  ;;  %v895_v16 = vor.u32 %v1175_v13, %v894_v12  ;;  %v1191_v17 = vld [vmem:[#allocation2 + $0xf4] sm:$0xf0]  ;;  %v1174_v18 = vld [vmem:[#allocation2 + $0x74] sm:$0xf]  ;;  %v67_v25 = vpack.c.bf16 %v66_v10, %v66_v10 }
  0x11   :  { %v896_v19 = vld [vmem:[#allocation2 + $0x78] sm:$0xf0]  ;;  %v959_v20 = vor.u32 %v1191_v17, %v958_v14  ;;  %v1190_v22 = vld [vmem:[#allocation2 + $0xf4] sm:$0xf]  ;;  %v886_v24 = vld [vmem:[#allocation2 + $0x60] sm:$0xf] }
  0x12   :  { %v899_v21 = vor.u32 %v1174_v18, %v896_v19  ;;  %v960_v23 = vld [vmem:[#allocation2 + $0xf8] sm:$0xf0]  ;;  %330 = vmatpush.bf16.msra.mxu2 %v895_v16  ;;  %v1173_v27 = vld [vmem:[#allocation2 + $0x64] sm:$0xf0]  ;;  %v950_v28 = vld [vmem:[#allocation2 + $0xe0] sm:$0xf] }
  0x13   :  { %v963_v26 = vor.u32 %v1190_v22, %v960_v23  ;;  %v1189_v29 = vld [vmem:[#allocation2 + $0xe4] sm:$0xf0]  ;;  %109 = vmatpush.bf16.msra.mxu0 %v821_v11  ;;  %343 = vmatpush.bf16.msra.mxu3 %v959_v20  ;;  %v887_v30 = vor.u32 %v1173_v27, %v886_v24  ;;  %v1172_v32 = vld [vmem:[#allocation2 + $0x64] sm:$0xf]  ;;  %v888_v33 = vld [vmem:[#allocation2 + $0x68] sm:$0xf0] }
  0x14   :  { %v951_v31 = vor.u32 %v1189_v29, %v950_v28  ;;  %v1188_v34 = vld [vmem:[#allocation2 + $0xe4] sm:$0xf]  ;;  %122 = vmatpush.bf16.msra.mxu1 %v825_v15  ;;  %v891_v35 = vor.u32 %v1172_v32, %v888_v33  ;;  %v952_v36 = vld [vmem:[#allocation2 + $0xe8] sm:$0xf0]  ;;  %v878_v37 = vld [vmem:[#allocation2 + $0x50] sm:$0xf] }
  0x15   :  { %v1171_v38 = vld [vmem:[#allocation2 + $0x54] sm:$0xf0]  ;;  %v955_v39 = vor.u32 %v1188_v34, %v952_v36  ;;  %v942_v40 = vld [vmem:[#allocation2 + $0xd0] sm:$0xf]  ;;  %v1170_v42 = vld [vmem:[#allocation2 + $0x54] sm:$0xf] }
  0x16   :  { %v1187_v41 = vld [vmem:[#allocation2 + $0xd4] sm:$0xf0]  ;;  %834 = vmatmul.msk.bf16.vlgmr.msra.gmra.mxu0 %vm98_vm0, %v67_v25  ;;  %331 = vmatpush.bf16.msra.mxu2 %v887_v30  ;;  %v879_v43 = vor.u32 %v1171_v38, %v878_v37  ;;  %v880_v44 = vld [vmem:[#allocation2 + $0x58] sm:$0xf0]  ;;  %v1186_v45 = vld [vmem:[#allocation2 + $0xd4] sm:$0xf] }
  0x17   :  { %356 = vmatpush.bf16.msrb.mxu0 %v899_v21  ;;  %v944_v46 = vld [vmem:[#allocation2 + $0xd8] sm:$0xf0]  ;;  %835 = vmatmul.msk.bf16.vlgmr.msra.gmra.mxu1 %vm98_vm0, %v67_v25  ;;  %v943_v47 = vor.u32 %v1187_v41, %v942_v40  ;;  %v870_v48 = vld [vmem:[#allocation2 + $0x40] sm:$0xf]  ;;  %v1169_v49 = vld [vmem:[#allocation2 + $0x44] sm:$0xf0]  ;;  %v883_v50 = vor.u32 %v1170_v42, %v880_v44 }
  0x18   :  { %369 = vmatpush.bf16.msrb.mxu1 %v963_v26  ;;  %344 = vmatpush.bf16.msra.mxu3 %v951_v31  ;;  %v934_v51 = vld [vmem:[#allocation2 + $0xc0] sm:$0xf]  ;;  %v1185_v52 = vld [vmem:[#allocation2 + $0xc4] sm:$0xf0]  ;;  %v947_v53 = vor.u32 %v1186_v45, %v944_v46  ;;  %v1168_v54 = vld [vmem:[#allocation2 + $0x44] sm:$0xf]  ;;  %v871_v56 = vor.u32 %v1169_v49, %v870_v48 }
  0x19   :  { %v872_v55 = vld [vmem:[#allocation2 + $0x48] sm:$0xf0]  ;;  %v1184_v57 = vld [vmem:[#allocation2 + $0xc4] sm:$0xf]  ;;  %v935_v59 = vor.u32 %v1185_v52, %v934_v51  ;;  %v862_v60 = vld [vmem:[#allocation2 + $0x30] sm:$0xf] }
  0x1a   :  { %332 = vmatpush.bf16.msra.mxu2 %v879_v43  ;;  %v936_v58 = vld [vmem:[#allocation2 + $0xc8] sm:$0xf0]  ;;  %v1167_v61 = vld [vmem:[#allocation2 + $0x34] sm:$0xf0]  ;;  %v875_v62 = vor.u32 %v1168_v54, %v872_v55  ;;  %v926_v63 = vld [vmem:[#allocation2 + $0xb0] sm:$0xf] }
  0x1b   :  { %357 = vmatpush.bf16.msrb.mxu0 %v891_v35  ;;  %v1183_v0 = vld [vmem:[#allocation2 + $0xb4] sm:$0xf0]  ;;  %v939_v1 = vor.u32 %v1184_v57, %v936_v58  ;;  %v1166_v2 = vld [vmem:[#allocation2 + $0x34] sm:$0xf]  ;;  %v864_v3 = vld [vmem:[#allocation2 + $0x38] sm:$0xf0]  ;;  %v863_v4 = vor.u32 %v1167_v61, %v862_v60 }
  0x1c   :  { %370 = vmatpush.bf16.msrb.mxu1 %v955_v39  ;;  %345 = vmatpush.bf16.msra.mxu3 %v943_v47  ;;  %v1182_v5 = vld [vmem:[#allocation2 + $0xb4] sm:$0xf]  ;;  %v928_v6 = vld [vmem:[#allocation2 + $0xb8] sm:$0xf0]  ;;  %v927_v7 = vor.u32 %v1183_v0, %v926_v63  ;;  %v854_v8 = vld [vmem:[#allocation2 + $0x20] sm:$0xf]  ;;  %v867_v10 = vor.u32 %v1166_v2, %v864_v3 }
  0x1d   :  { %v1165_v9 = vld [vmem:[#allocation2 + $0x24] sm:$0xf0]  ;;  %v918_v11 = vld [vmem:[#allocation2 + $0xa0] sm:$0xf]  ;;  %v931_v13 = vor.u32 %v1182_v5, %v928_v6  ;;  %v1164_v14 = vld [vmem:[#allocation2 + $0x24] sm:$0xf] }
  0x1e   :  { %333 = vmatpush.bf16.msra.mxu2 %v871_v56  ;;  %v1181_v12 = vld [vmem:[#allocation2 + $0xa4] sm:$0xf0]  ;;  %v856_v15 = vld [vmem:[#allocation2 + $0x28] sm:$0xf0]  ;;  %v855_v16 = vor.u32 %v1165_v9, %v854_v8  ;;  %v1180_v17 = vld [vmem:[#allocation2 + $0xa4] sm:$0xf] }
  0x1f   :  { %358 = vmatpush.bf16.msrb.mxu0 %v883_v50  ;;  %v920_v18 = vld [vmem:[#allocation2 + $0xa8] sm:$0xf0]  ;;  %v919_v19 = vor.u32 %v1181_v12, %v918_v11  ;;  %v859_v20 = vor.u32 %v1164_v14, %v856_v15  ;;  %v846_v22 = vld [vmem:[#allocation2 + $0x10] sm:$0xf]  ;;  %v1163_v23 = vld [vmem:[#allocation2 + $0x14] sm:$0xf0] }
  0x20   :  { %371 = vmatpush.bf16.msrb.mxu1 %v947_v53  ;;  %346 = vmatpush.bf16.msra.mxu3 %v935_v59  ;;  %v923_v21 = vor.u32 %v1180_v17, %v920_v18  ;;  %v910_v24 = vld [vmem:[#allocation2 + $0x90] sm:$0xf]  ;;  %v847_v25 = vor.u32 %v1163_v23, %v846_v22  ;;  %v1179_v26 = vld [vmem:[#allocation2 + $0x94] sm:$0xf0]  ;;  %v1162_v27 = vld [vmem:[#allocation2 + $0x14] sm:$0xf] }
  0x21   :  { %v848_v28 = vld [vmem:[#allocation2 + $0x18] sm:$0xf0]  ;;  %v911_v29 = vor.u32 %v1179_v26, %v910_v24  ;;  %v1178_v31 = vld [vmem:[#allocation2 + $0x94] sm:$0xf]  ;;  %v838_v34 = vld [vmem:[#allocation2] sm:$0xf] }
  0x22   :  { %334 = vmatpush.bf16.msra.mxu2 %v863_v4  ;;  %v851_v30 = vor.u32 %v1162_v27, %v848_v28  ;;  %v912_v32 = vld [vmem:[#allocation2 + $0x98] sm:$0xf0]  ;;  %v1161_v35 = vld [vmem:[#allocation2 + $0x4] sm:$0xf0]  ;;  %v902_v36 = vld [vmem:[#allocation2 + $0x80] sm:$0xf] }
  0x23   :  { %359 = vmatpush.bf16.msrb.mxu0 %v875_v62  ;;  %v915_v33 = vor.u32 %v1178_v31, %v912_v32  ;;  %v839_v37 = vor.u32 %v1161_v35, %v838_v34  ;;  %v1177_v38 = vld [vmem:[#allocation2 + $0x84] sm:$0xf0]  ;;  %v1160_v39 = vld [vmem:[#allocation2 + $0x4] sm:$0xf]  ;;  %v840_v40 = vld [vmem:[#allocation2 + $0x8] sm:$0xf0] }
  0x24   :  { %372 = vmatpush.bf16.msrb.mxu1 %v939_v1  ;;  %347 = vmatpush.bf16.msra.mxu3 %v927_v7  ;;  %v903_v41 = vor.u32 %v1177_v38, %v902_v36  ;;  %v843_v42 = vor.u32 %v1160_v39, %v840_v40  ;;  %v1176_v43 = vld [vmem:[#allocation2 + $0x84] sm:$0xf]  ;;  %v904_v44 = vld [vmem:[#allocation2 + $0x88] sm:$0xf0]  ;;  %v1086_v46 = vld [vmem:[#allocation5 + $0xf0] sm:$0xf] }
  0x25   :  { %v907_v45 = vor.u32 %v1176_v43, %v904_v44  ;;  %v1223_v47 = vld [vmem:[#allocation5 + $0xf4] sm:$0xf0]  ;;  %v1222_v48 = vld [vmem:[#allocation5 + $0xf4] sm:$0xf]  ;;  %v1088_v50 = vld [vmem:[#allocation5 + $0xf8] sm:$0xf0] }
  0x26   :  { %335 = vmatpush.bf16.msra.mxu2 %v855_v16  ;;  %v1087_v49 = vor.u32 %v1223_v47, %v1086_v46  ;;  %v1078_v51 = vld [vmem:[#allocation5 + $0xe0] sm:$0xf]  ;;  %v1221_v52 = vld [vmem:[#allocation5 + $0xe4] sm:$0xf0]  ;;  %v1091_v53 = vor.u32 %v1222_v48, %v1088_v50  ;;  %v1220_v54 = vld [vmem:[#allocation5 + $0xe4] sm:$0xf] }
  0x27   :  { %360 = vmatpush.bf16.msrb.mxu0 %v867_v10  ;;  %v1080_v55 = vld [vmem:[#allocation5 + $0xe8] sm:$0xf0]  ;;  %v1022_v56 = vld [vmem:[#allocation5 + $0x70] sm:$0xf]  ;;  %v1079_v57 = vor.u32 %v1221_v52, %v1078_v51  ;;  %v1207_v58 = vld [vmem:[#allocation5 + $0x74] sm:$0xf0] }
  0x28   :  { %373 = vmatpush.bf16.msrb.mxu1 %v931_v13  ;;  %348 = vmatpush.bf16.msra.mxu3 %v919_v19  ;;  %v1206_v59 = vld [vmem:[#allocation5 + $0x74] sm:$0xf]  ;;  %v1024_v60 = vld [vmem:[#allocation5 + $0x78] sm:$0xf0]  ;;  %v1083_v61 = vor.u32 %v1220_v54, %v1080_v55  ;;  %v1023_v62 = vor.u32 %v1207_v58, %v1022_v56  ;;  %v1070_v0 = vld [vmem:[#allocation5 + $0xd0] sm:$0xf] }
  0x29   :  { %v1027_v63 = vor.u32 %v1206_v59, %v1024_v60  ;;  %v1219_v1 = vld [vmem:[#allocation5 + $0xd4] sm:$0xf0]  ;;  %v1218_v2 = vld [vmem:[#allocation5 + $0xd4] sm:$0xf]  ;;  %v1072_v3 = vld [vmem:[#allocation5 + $0xd8] sm:$0xf0] }
  0x2a   :  { %336 = vmatpush.bf16.msra.mxu2 %v847_v25  ;;  %v1014_v4 = vld [vmem:[#allocation5 + $0x60] sm:$0xf]  ;;  %v1205_v5 = vld [vmem:[#allocation5 + $0x64] sm:$0xf0]  ;;  %v1204_v7 = vld [vmem:[#allocation5 + $0x64] sm:$0xf]  ;;  %v1071_v9 = vor.u32 %v1219_v1, %v1070_v0  ;;  %v1075_v13 = vor.u32 %v1218_v2, %v1072_v3 }
  0x2b   :  { %361 = vmatpush.bf16.msrb.mxu0 %v859_v20  ;;  %v1015_v6 = vor.u32 %v1205_v5, %v1014_v4  ;;  %v1016_v8 = vld [vmem:[#allocation5 + $0x68] sm:$0xf0]  ;;  %v1062_v11 = vld [vmem:[#allocation5 + $0xc0] sm:$0xf]  ;;  %v1217_v12 = vld [vmem:[#allocation5 + $0xc4] sm:$0xf0] }
  0x2c   :  { %374 = vmatpush.bf16.msrb.mxu1 %v923_v21  ;;  %349 = vmatpush.bf16.msra.mxu3 %v911_v29  ;;  %v1019_v10 = vor.u32 %v1204_v7, %v1016_v8  ;;  %v1006_v14 = vld [vmem:[#allocation5 + $0x50] sm:$0xf]  ;;  %v1203_v15 = vld [vmem:[#allocation5 + $0x54] sm:$0xf0]  ;;  %v1202_v16 = vld [vmem:[#allocation5 + $0x54] sm:$0xf]  ;;  %v1063_v23 = vor.u32 %v1217_v12, %v1062_v11 }
  0x2d   :  { %v1216_v17 = vld [vmem:[#allocation5 + $0xc4] sm:$0xf]  ;;  %v1064_v18 = vld [vmem:[#allocation5 + $0xc8] sm:$0xf0]  ;;  %v1008_v19 = vld [vmem:[#allocation5 + $0x58] sm:$0xf0]  ;;  %v1007_v20 = vor.u32 %v1203_v15, %v1006_v14 }
  0x2e   :  { %337 = vmatpush.bf16.msra.mxu2 %v839_v37  ;;  %v1011_v21 = vor.u32 %v1202_v16, %v1008_v19  ;;  %v998_v22 = vld [vmem:[#allocation5 + $0x40] sm:$0xf]  ;;  %v1201_v24 = vld [vmem:[#allocation5 + $0x44] sm:$0xf0]  ;;  %v1200_v25 = vld [vmem:[#allocation5 + $0x44] sm:$0xf]  ;;  %v1067_v27 = vor.u32 %v1216_v17, %v1064_v18 }
  0x2f   :  { %362 = vmatpush.bf16.msrb.mxu0 %v851_v30  ;;  %v1000_v26 = vld [vmem:[#allocation5 + $0x48] sm:$0xf0]  ;;  %v1054_v28 = vld [vmem:[#allocation5 + $0xb0] sm:$0xf]  ;;  %v1215_v29 = vld [vmem:[#allocation5 + $0xb4] sm:$0xf0]  ;;  %v999_v32 = vor.u32 %v1201_v24, %v998_v22 }
  0x30   :  { %375 = vmatpush.bf16.msrb.mxu1 %v915_v33  ;;  %350 = vmatpush.bf16.msra.mxu3 %v903_v41  ;;  %v1214_v30 = vld [vmem:[#allocation5 + $0xb4] sm:$0xf]  ;;  %v1056_v31 = vld [vmem:[#allocation5 + $0xb8] sm:$0xf0]  ;;  %v1003_v33 = vor.u32 %v1200_v25, %v1000_v26  ;;  %v1055_v34 = vor.u32 %v1215_v29, %v1054_v28  ;;  %v1046_v36 = vld [vmem:[#allocation5 + $0xa0] sm:$0xf] }
  0x31   :  { %v1059_v35 = vor.u32 %v1214_v30, %v1056_v31  ;;  %v1213_v37 = vld [vmem:[#allocation5 + $0xa4] sm:$0xf0]  ;;  %v72_v38 = vld [vmem:[%s1479_s2] sm:$0x3]  ;;  %v1212_v39 = vld [vmem:[#allocation5 + $0xa4] sm:$0xf] }
  0x32   :  { %584 = vmatpush.bf16.msrb.mxu2 %v1023_v62  ;;  %v1048_v40 = vld [vmem:[#allocation5 + $0xa8] sm:$0xf0]  ;;  %v1047_v41 = vor.u32 %v1213_v37, %v1046_v36  ;;  %v75_v44 = vperm.slane %v72_v38, 1  ;;  %v990_v55 = vld [vmem:[#allocation5 + $0x30] sm:$0xf]  ;;  %v1231_v28 = vld [vmem:[%s1484_s7 + $0x38] sm:$0xff] }
  0x33   :  { %363 = vmatpush.bf16.msrb.mxu0 %v843_v42  ;;  %v74_v42 = vperm.slane %v72_v38, 0  ;;  %v1051_v43 = vor.u32 %v1212_v39, %v1048_v40  ;;  %v1199_v56 = vld [vmem:[#allocation5 + $0x34] sm:$0xf0]  ;;  %v992_v59 = vld [vmem:[#allocation5 + $0x38] sm:$0xf0]  ;;  %v1238_v29 = vld [vmem:[%s1484_s7 + $0x70] sm:$0xff] }
  0x34   :  { %376 = vmatpush.bf16.msrb.mxu1 %v907_v45  ;;  %597 = vmatpush.bf16.msrb.mxu3 %v1087_v49  ;;  %v991_v58 = vor.u32 %v1199_v56, %v990_v55  ;;  %v1211_v62 = vld [vmem:[#allocation5 + $0x94] sm:$0xf0]  ;;  %v1040_v1 = vld [vmem:[#allocation5 + $0x98] sm:$0xf0]  ;;  %v982_v3 = vld [vmem:[#allocation5 + $0x20] sm:$0xf] }
  0x35   :  { %v1197_v4 = vld [vmem:[#allocation5 + $0x24] sm:$0xf0]  ;;  %v1196_v5 = vld [vmem:[#allocation5 + $0x24] sm:$0xf]  ;;  %v984_v7 = vld [vmem:[#allocation5 + $0x28] sm:$0xf0] }
  0x36   :  { %585 = vmatpush.bf16.msrb.mxu2 %v1015_v6  ;;  %v983_v6 = vor.u32 %v1197_v4, %v982_v3  ;;  %v987_v8 = vor.u32 %v1196_v5, %v984_v7  ;;  %v1208_v11 = vld [vmem:[#allocation5 + $0x84] sm:$0xf]  ;;  %v974_v15 = vld [vmem:[#allocation5 + $0x10] sm:$0xf]  ;;  %v1195_v16 = vld [vmem:[#allocation5 + $0x14] sm:$0xf0] }
  0x37   :  { %610 = vmatpush.bf16.msra.mxu0 %v1027_v63  ;;  %v1210_v63 = vld [vmem:[#allocation5 + $0x94] sm:$0xf]  ;;  %v975_v17 = vor.u32 %v1195_v16, %v974_v15  ;;  %v976_v19 = vld [vmem:[#allocation5 + $0x18] sm:$0xf0]  ;;  %v1193_v22 = vld [vmem:[#allocation5 + $0x4] sm:$0xf0] }
  0x38   :  { %623 = vmatpush.bf16.msra.mxu1 %v1091_v53  ;;  %598 = vmatpush.bf16.msrb.mxu3 %v1079_v57  ;;  %v1198_v57 = vld [vmem:[#allocation5 + $0x34] sm:$0xf]  ;;  %v1043_v2 = vor.u32 %v1210_v63, %v1040_v1  ;;  %v968_v25 = vld [vmem:[#allocation5 + $0x8] sm:$0xf0]  ;;  %v1227_v56 = vld [vmem:[%s1484_s7 + $0x18] sm:$0xff]  ;;  %s1328_s23 = smov [#allocation7]  }
  0x39   :  { %v995_v60 = vor.u32 %v1198_v57, %v992_v59  ;;  %v1194_v18 = vld [vmem:[#allocation5 + $0x14] sm:$0xf]  ;;  %v1237_v31 = vld [vmem:[%s1484_s7 + $0x68] sm:$0xff]  ;;  %v1232_v59 = vld [vmem:[%s1484_s7 + $0x40] sm:$0xff]  ;;  %s805_s5 = sshll.u32 %s1328_s23, 4  ;;  %s807_s26 = sshll.u32 %s1486_s9, 4  ;;  %s806_s5 = int_to_ptr.vmem [resolvable:$true] %s805_s5  ;;  %s808_s26 = int_to_ptr.hbm [resolvable:$true] %s807_s26 }
  0x3a   :  { %586 = vmatpush.bf16.msrb.mxu2 %v1007_v20  ;;  %v979_v20 = vor.u32 %v1194_v18, %v976_v19  ;;  %v1230_v30 = vld [vmem:[%s1484_s7 + $0x30] sm:$0xff]  ;;  %v1233_v57 = vld [vmem:[%s1484_s7 + $0x48] sm:$0xff]  ;;  %v418_v63 = vld [vmem:[%s1483_s6] sm:$0x3]  ;;  %vm798_vm1 = vcmask 56320  }
  0x3b   :  { %611 = vmatpush.bf16.msra.mxu0 %v1019_v10  ;;  %v1209_v10 = vld [vmem:[#allocation5 + $0x84] sm:$0xf0]  ;;  %v1234_v55 = vld [vmem:[%s1484_s7 + $0x50] sm:$0xff]  ;;  %v1245_v18 = vld [vmem:[%s1485_s8] ss:$0 sm:$0xff] }
  0x3c   :  { %624 = vmatpush.bf16.msra.mxu1 %v1083_v61  ;;  %599 = vmatpush.bf16.msrb.mxu3 %v1071_v9  ;;  %v1038_v61 = vld [vmem:[#allocation5 + $0x90] sm:$0xf]  ;;  %v1030_v9 = vld [vmem:[#allocation5 + $0x80] sm:$0xf] }
  0x3d   :  { %v1039_v0 = vor.u32 %v1211_v62, %v1038_v61  ;;  %v1031_v12 = vor.u32 %v1209_v10, %v1030_v9  ;;  %v1224_v61 = vld [vmem:[%s1484_s7] sm:$0xff] }
  0x3e   :  { %587 = vmatpush.bf16.msrb.mxu2 %v999_v32  ;;  %v1229_v32 = vld [vmem:[%s1484_s7 + $0x28] sm:$0xff] }
  0x3f   :  { %612 = vmatpush.bf16.msra.mxu0 %v1011_v21  ;;  %v966_v21 = vld [vmem:[#allocation5] sm:$0xf] }
  0x40   :  { %625 = vmatpush.bf16.msra.mxu1 %v1075_v13  ;;  %600 = vmatpush.bf16.msrb.mxu3 %v1063_v23  ;;  %v1032_v13 = vld [vmem:[#allocation5 + $0x88] sm:$0xf0]  ;;  %v1192_v23 = vld [vmem:[#allocation5 + $0x4] sm:$0xf]  ;;  %v967_v24 = vor.u32 %v1193_v22, %v966_v21 }
  0x41   :  { %v1035_v14 = vor.u32 %v1208_v11, %v1032_v13  ;;  %v971_v26 = vor.u32 %v1192_v23, %v968_v25 }
  0x42   :  { %588 = vmatpush.bf16.msrb.mxu2 %v991_v58  ;;  %v1226_v58 = vld [vmem:[%s1484_s7 + $0x10] sm:$0xff] }
  0x43   :  { %613 = vmatpush.bf16.msra.mxu0 %v1003_v33  ;;  %v1236_v33 = vld [vmem:[%s1484_s7 + $0x60] sm:$0xff] }
  0x44   :  { %626 = vmatpush.bf16.msra.mxu1 %v1067_v27  ;;  %601 = vmatpush.bf16.msrb.mxu3 %v1055_v34  ;;  %v1239_v27 = vld [vmem:[%s1484_s7 + $0x78] sm:$0xff]  ;;  %v164_v34 = vld [vmem:[%s1481_s4] sm:$0x3] }
  0x45   :  { %v166_v40 = vperm.slane %v164_v34, 0 }
  0x46   :  { %589 = vmatpush.bf16.msrb.mxu2 %v983_v6  ;;  %v420_v6 = vperm.slane %v418_v63, 0 }
  0x47   :  { %614 = vmatpush.bf16.msra.mxu0 %v995_v60  ;;  %v1225_v60 = vld [vmem:[%s1484_s7 + $0x8] sm:$0xff] }
  0x48   :  { %627 = vmatpush.bf16.msra.mxu1 %v1059_v35  ;;  %602 = vmatpush.bf16.msrb.mxu3 %v1047_v41  ;;  %v167_v35 = vperm.slane %v164_v34, 1 }
  0x4a   :  { %590 = vmatpush.bf16.msrb.mxu2 %v975_v17 }
  0x4b   :  { %615 = vmatpush.bf16.msra.mxu0 %v987_v8 }
  0x4c   :  { %628 = vmatpush.bf16.msra.mxu1 %v1051_v43  ;;  %603 = vmatpush.bf16.msrb.mxu3 %v1039_v0  ;;  %v421_v0 = vperm.slane %v418_v63, 1 }
  0x4e   :  { %591 = vmatpush.bf16.msrb.mxu2 %v967_v24 }
  0x4f   :  { %616 = vmatpush.bf16.msra.mxu0 %v979_v20 }
  0x50   :  { %629 = vmatpush.bf16.msra.mxu1 %v1043_v2  ;;  %604 = vmatpush.bf16.msrb.mxu3 %v1031_v12 }
  0x53   :  { %617 = vmatpush.bf16.msra.mxu0 %v971_v26 }
  0x54   :  { %630 = vmatpush.bf16.msra.mxu1 %v1035_v14 }
  0x93   :  { %v111_v45 = vpop.f32.mrf.mxu0 }
  0x94   :  { %v112_v46 = vadd.f32 %v111_v45, %v74_v42  ;;  %v124_v47 = vpop.f32.mrf.mxu1 }
  0x95   :  { %v125_v48 = vadd.f32 %v124_v47, %v75_v44 }
  0x96   :  { %v128_v49 = vmax.f32 %v112_v46, 0.0 }
  0x97   :  { %v129_v50 = vmax.f32 %v125_v48, 0.0 }
  0x98   :  { %v130_v51 = vpack.c.bf16 %v128_v49, %v128_v49 }
  0x99   :  { %v131_v52 = vpack.c.bf16 %v129_v50, %v129_v50 }
  0x9a   :  { %338 = vmatmul.bf16.vlgmr.msra.gmra.mxu2 %v130_v51  ;;  %364 = vmatmul.bf16.vlgmr.msrb.gmra.mxu0 %v130_v51 }
  0x9b   :  { %351 = vmatmul.bf16.vlgmr.msra.gmra.mxu3 %v131_v52  ;;  %377 = vmatmul.bf16.vlgmr.msrb.gmra.mxu1 %v131_v52  ;;  %v113_v53 = vpop.f32.mrf.mxu0 }
  0x9c   :  { %v126_v54 = vpop.f32.mrf.mxu1  ;;  %785 = vmatpush.bf16.msra.mxu3 %v1239_v27  ;;  %772 = vmatpush.bf16.msra.mxu2 %v1231_v28  ;;  %v1235_v53 = vld [vmem:[%s1484_s7 + $0x58] sm:$0xff] }
  0x9d   :  { %v1228_v54 = vld [vmem:[%s1484_s7 + $0x20] sm:$0xff] }
  0xa0   :  { %786 = vmatpush.bf16.msra.mxu3 %v1238_v29  ;;  %773 = vmatpush.bf16.msra.mxu2 %v1230_v30 }
  0xa4   :  { %787 = vmatpush.bf16.msra.mxu3 %v1237_v31  ;;  %774 = vmatpush.bf16.msra.mxu2 %v1229_v32 }
  0xa8   :  { %788 = vmatpush.bf16.msra.mxu3 %v1236_v33  ;;  %775 = vmatpush.bf16.msra.mxu2 %v1228_v54 }
  0xac   :  { %789 = vmatpush.bf16.msra.mxu3 %v1235_v53  ;;  %776 = vmatpush.bf16.msra.mxu2 %v1227_v56 }
  0xb0   :  { %790 = vmatpush.bf16.msra.mxu3 %v1234_v55  ;;  %777 = vmatpush.bf16.msra.mxu2 %v1226_v58 }
  0xb4   :  { %791 = vmatpush.bf16.msra.mxu3 %v1233_v57  ;;  %778 = vmatpush.bf16.msra.mxu2 %v1225_v60 }
  0xb8   :  { %792 = vmatpush.bf16.msra.mxu3 %v1232_v59  ;;  %779 = vmatpush.bf16.msra.mxu2 %v1224_v61 }
 0x117   :  { %v365_v36 = vpop.f32.mrf.mxu0 }
 0x118   :  { %v366_v37 = vadd.f32 %v365_v36, %v167_v35  ;;  %v378_v38 = vpop.f32.mrf.mxu1 }
 0x11a   :  { %v379_v39 = vadd.f32 %v378_v38, %v366_v37 }
 0x11c   :  { %v383_v41 = vmax.f32 %v379_v39, 0.0 }
 0x11d   :  { %v339_v42 = vpop.f32.mrf.mxu2 }
 0x11e   :  { %v385_v43 = vpack.c.bf16 %v383_v41, %v383_v41  ;;  %v340_v44 = vadd.f32 %v339_v42, %v166_v40  ;;  %v352_v45 = vpop.f32.mrf.mxu3 }
 0x11f   :  { %v367_v46 = vpop.f32.mrf.mxu0 }
 0x120   :  { %v353_v47 = vadd.f32 %v352_v45, %v340_v44  ;;  %v380_v48 = vpop.f32.mrf.mxu1  ;;  %605 = vmatmul.bf16.vlgmr.msrb.gmra.mxu3 %v385_v43  ;;  %631 = vmatmul.bf16.vlgmr.msra.gmra.mxu1 %v385_v43 }
 0x122   :  { %v382_v49 = vmax.f32 %v353_v47, 0.0 }
 0x124   :  { %v384_v50 = vpack.c.bf16 %v382_v49, %v382_v49 }
 0x125   :  { %v341_v51 = vpop.f32.mrf.mxu2 }
 0x126   :  { %v354_v52 = vpop.f32.mrf.mxu3  ;;  %592 = vmatmul.bf16.vlgmr.msrb.gmra.mxu2 %v384_v50  ;;  %618 = vmatmul.bf16.vlgmr.msra.gmra.mxu0 %v384_v50 }
 0x19d   :  { %v632_v62 = vpop.f32.mrf.mxu1 }
 0x1a3   :  { %v606_v1 = vpop.f32.mrf.mxu3  ;;  %v619_v2 = vpop.f32.mrf.mxu0 }
 0x1a4   :  { %v620_v3 = vadd.f32 %v619_v2, %v421_v0 }
 0x1a5   :  { %v634_v4 = vpop.f32.mrf.mxu1 }
 0x1a6   :  { %v633_v5 = vadd.f32 %v632_v62, %v620_v3 }
 0x1a8   :  { %v637_v7 = vmax.f32 %v633_v5, 0.0 }
 0x1a9   :  { %v593_v8 = vpop.f32.mrf.mxu2 }
 0x1aa   :  { %v639_v9 = vpack.c.bf16 %v637_v7, %v637_v7  ;;  %v594_v10 = vadd.f32 %v593_v8, %v420_v6 }
 0x1ab   :  { %v608_v11 = vpop.f32.mrf.mxu3  ;;  %v621_v12 = vpop.f32.mrf.mxu0 }
 0x1ac   :  { %v607_v13 = vadd.f32 %v606_v1, %v594_v10  ;;  %793 = vmatmul.bf16.vlgmr.msra.gmra.mxu3 %v639_v9 }
 0x1ae   :  { %v636_v14 = vmax.f32 %v607_v13, 0.0 }
 0x1b0   :  { %v638_v15 = vpack.c.bf16 %v636_v14, %v636_v14 }
 0x1b1   :  { %v595_v16 = vpop.f32.mrf.mxu2 }
 0x1b2   :  { %780 = vmatmul.bf16.vlgmr.msra.gmra.mxu2 %v638_v15 }
 0x22f   :  { %v794_v17 = vpop.f32.mrf.mxu3 }
 0x235   :  { %v781_v19 = vpop.f32.mrf.mxu2 }
 0x236   :  { %v782_v20 = vadd.f32 %v1245_v18, %v781_v19 }
 0x237   :  { %v796_v21 = vpop.f32.mrf.mxu3 }
 0x238   :  { %v795_v22 = vadd.f32 %v794_v17, %v782_v20 }
 0x23a   :  { %799 = vst.msk [vmem:[#allocation7] sm:$0xff] %vm798_vm1, %v795_v22 }
 0x23b   :  { %810 = dma.vmem_to_hbm [thread:$0]  %s806_s5, 128, %s808_s26, [#allocation4]  }
 0x23d   :  { %v783_v23 = vpop.f32.mrf.mxu2 }
 0x23e   :  { %1322 = dma.done.wait [#allocation4], 128  }
 0x23f   :  { %1323 = vsyncadd [#allocation4], 4294967168 }
 0x240   :  { %815 = vsyncpa [#allocation3], 1 }
 0x241   :  { %816 = vsyncpa [#allocation6], 1 }
 0x242   :  { %817 = vsyncpa [#allocation4], 1 }

</bundles_post_ra>
